<compile_context>
chip_gen: v7x
topology: tpu7x:2x2x1
jax: 0.10.0
libtpu: 0.0.40
codegen_flags: <defaults>
</compile_context>

<pallas_src>
import functools

import jax
import jax.numpy as jnp
from jax.experimental import pallas as pl
from jax.experimental.pallas import tpu as pltpu


def _round_up(x, m):
    return (x + m - 1) // m * m


def _vmem_budget_bytes():
    """Generation-aware scoped-VMEM budget (v7x: 64 MiB physical, v5e/v6e: 128)."""
    try:
        cap = int(pltpu.get_tpu_info().vmem_capacity_bytes)
    except Exception:
        cap = 64 * 1024 * 1024          # conservative fallback: fits every gen
    return (cap * 3) // 4               # leave headroom for the compiler


def _pick_stage1_tiles(C_pad, D_pad):
    """Largest multiples of 128 (<= 512) that divide the padded dims."""
    def fit(n, cap=512):
        t = min(n, cap)
        while n % t:
            t -= 128
        return t
    return fit(C_pad), fit(D_pad)


def _pick_stage2_tiles(B, C_pad, budget):
    """Batch tile TB and D2 class-row block tcc for stage 2."""
    # --- batch tile --------------------------------------------------------
    cap = 2048 if C_pad <= 256 else (1024 if C_pad <= 1024 else 512)
    # keep the double-buffered f32 prediction tile within ~half the budget
    while cap > 128 and 2 * C_pad * cap * 4 > budget // 2:
        cap //= 2
    if B <= 128:
        TB = _round_up(B, 8)            # single tile; too little work to split
    else:
        # >= 2 tiles so both v7x TensorCores get work; multiples of 128 keep
        # the lane-dense (1, TB) output blocks unmasked.
        TB = min(cap, _round_up(pl.cdiv(B, 2), 128))
    # --- D2 block ----------------------------------------------------------
    pred_bytes = 2 * C_pad * TB * 4                  # double-buffered pred tile
    avail = budget - pred_bytes - (2 << 20)          # scratch / out headroom
    if C_pad * C_pad * 2 <= avail:
        tcc = C_pad                                  # resident, single VMEM copy
    else:
        tcc = 128                                    # stream D2 row blocks
        cand = C_pad - 128
        while cand >= 256:
            if C_pad % cand == 0 and 2 * C_pad * cand * 2 <= avail:
                tcc = cand
                break
            cand -= 128
    return TB, tcc


# ---------------------------------------------------------------------------
# Stage 1: pairwise squared distances between (optionally normalized) W rows.
# ---------------------------------------------------------------------------
def _weight_dist2_kernel(wi_ref, wj_ref, d2_ref, g_acc, sqi_acc, sqj_acc,
                         *, calibrate):
    k = pl.program_id(2)

    @pl.when(k == 0)
    def _():
        g_acc[...] = jnp.zeros_like(g_acc)
        sqi_acc[...] = jnp.zeros_like(sqi_acc)
        sqj_acc[...] = jnp.zeros_like(sqj_acc)

    wi = wi_ref[...]                                   # (TC, TK) f32
    wj = wj_ref[...]                                   # (TC, TK) f32

    # Gram block on the MXU; contracting dim 1 of both operands avoids
    # materializing a W.T transpose in VMEM.
    g_acc[...] += jax.lax.dot_general(
        wi, wj, (((1,), (1,)), ((), ())), preferred_element_type=jnp.float32)

    # Partial squared row norms, accumulated directly from W (no [C,C] diag
    # extraction).  The ones-vector matmuls land the results already in the
    # broadcast-friendly orientations -> no per-tile transposes.
    ones_k = jnp.ones((1, wi.shape[1]), jnp.float32)
    sqi_acc[...] += jax.lax.dot_general(
        wi * wi, ones_k, (((1,), (1,)), ((), ())),
        preferred_element_type=jnp.float32)            # (TC, 1)
    sqj_acc[...] += jax.lax.dot_general(
        ones_k, wj * wj, (((1,), (1,)), ((), ())),
        preferred_element_type=jnp.float32)            # (1, TC)

    @pl.when(k == pl.num_programs(2) - 1)
    def _():
        g = g_acc[...]
        sqi = sqi_acc[...]
        sqj = sqj_acc[...]
        if calibrate:
            # ||wi/|wi| - wj/|wj|||^2 = 2 - 2 <wi,wj> / (|wi| |wj|)
            inv_ni = jax.lax.rsqrt(jnp.maximum(sqi, 1e-30))
            inv_nj = jax.lax.rsqrt(jnp.maximum(sqj, 1e-30))
            d2 = 2.0 - 2.0 * g * inv_ni * inv_nj
        else:
            d2 = sqi + sqj - 2.0 * g
        # subtraction / clamp kept in f32; only the final store is bf16.
        d2_ref[...] = jnp.maximum(d2, 0.0).astype(d2_ref.dtype)


# ---------------------------------------------------------------------------
# Stage 2: per-sample min_{c != j0} (y_j0 - y_c) / (K * ||w_j0 - w_c||).
# ---------------------------------------------------------------------------
def _margin_ratio_kernel(invk_ref, pred_ref, d2_ref, out_ref,
                         topv_sc, topi_sc, min_sc, *, tcc):
    # Layout: classes on sublanes, batch on lanes -> all reductions keep dims
    # and the per-sample output is already a lane-dense (1, TB) row.
    j = pl.program_id(1)
    Cp, TB = pred_ref.shape

    row_ids = jax.lax.broadcasted_iota(jnp.int32, (Cp, TB), 0)

    @pl.when(j == 0)
    def _():
        pred = pred_ref[...]                                     # (Cp, TB)
        top_val = jnp.max(pred, axis=0, keepdims=True)           # (1, TB)
        # first-max index on ties (matches torch.topk / argmax)
        top_idx = jnp.min(jnp.where(pred == top_val, row_ids, Cp),
                          axis=0, keepdims=True)                 # (1, TB) i32
        topv_sc[...] = top_val
        topi_sc[...] = top_idx
        min_sc[...] = jnp.full_like(min_sc, jnp.inf)

    top_val = topv_sc[...]
    top_idx = topi_sc[...]

    # One-hot of the predicted class (exact in bf16); one MXU matmul gathers
    # D2[c, j0(b)] for every class-row c of this block (D2 is symmetric so a
    # row block doubles as a column block).  bf16 x bf16 -> f32 accumulate.
    is_pred_full = row_ids == top_idx                            # (Cp, TB)
    onehot = is_pred_full.astype(jnp.bfloat16)
    kij_sq = jnp.dot(d2_ref[...], onehot,
                     preferred_element_type=jnp.float32)         # (tcc, TB)

    if tcc == Cp:                     # resident D2: reuse full mask / pred
        pred_blk = pred_ref[...]
        is_pred = is_pred_full
    else:                             # streamed D2: slice this class-row block
        row0 = pl.multiple_of(j * tcc, tcc)
        pred_blk = pred_ref[pl.ds(row0, tcc), :]
        blk_ids = row0 + jax.lax.broadcasted_iota(jnp.int32, (tcc, TB), 0)
        is_pred = blk_ids == top_idx

    # predicted class -> +inf margin (padded classes are already +inf because
    # the wrapper pads prediction columns with -inf).
    margins = jnp.where(is_pred, jnp.inf, top_val - pred_blk)
    # eps floor: duplicate weight rows give D2 == 0; a 0-margin tie would
    # otherwise produce 0 * inf = NaN (reference yields ~0).
    ratios = margins * jax.lax.rsqrt(jnp.maximum(kij_sq, 1e-12))
    min_sc[...] = jnp.minimum(min_sc[...],
                              jnp.min(ratios, axis=0, keepdims=True))

    @pl.when(j == pl.num_programs(1) - 1)
    def _():
        # scalar 1/K applied once per sample (kW = K*W is never materialized)
        out_ref[...] = min_sc[...] * invk_ref[0]


# ---------------------------------------------------------------------------
# Wrapper
# ---------------------------------------------------------------------------
def margin_ratio(prediction, W, K, *, reduce='mean', calibrate_outputs=True):
    """prediction: [B, C] f32, W: [C, D] f32, K: positive scalar."""
    prediction = jnp.asarray(prediction, jnp.float32)
    W = jnp.asarray(W, jnp.float32)
    B, C = prediction.shape
    Cw, D = W.shape
    assert Cw == C, (Cw, C)

    C_pad = _round_up(C, 128)
    D_pad = _round_up(D, 128)
    budget = _vmem_budget_bytes()
    TC, TK = _pick_stage1_tiles(C_pad, D_pad)
    TB, tcc = _pick_stage2_tiles(B, C_pad, budget)
    B_pad = _round_up(B, TB)

    # Padded prediction columns -> -inf so (a) they never become the argmax and
    # (b) their margins become +inf and cannot win the per-sample min.  Padded
    # batch rows -> 0 (ratio 0, sliced away).  The transpose puts classes on
    # sublanes / batch on lanes (lane-dense stage-2 output); layout plumbing
    # done once here in the wrapper.
    pred_p = jnp.pad(prediction, ((0, 0), (0, C_pad - C)),
                     constant_values=float('-inf'))
    pred_p = jnp.pad(pred_p, ((0, B_pad - B), (0, 0)), constant_values=0.0)
    pred_t = pred_p.T                                      # [C_pad, B_pad]

    # Padded W feature columns: zeros (norms / dots unchanged); padded class
    # rows: ones (non-zero norm so calibration never hits rsqrt(0)).
    W_p = jnp.pad(W, ((0, 0), (0, D_pad - D)), constant_values=0.0)
    W_p = jnp.pad(W_p, ((0, C_pad - C), (0, 0)), constant_values=1.0)

    nI = C_pad // TC
    nK = D_pad // TK

    # -- Stage 1: [C_pad, C_pad] pairwise squared distances (bf16 output). ----
    d2 = pl.pallas_call(
        functools.partial(_weight_dist2_kernel, calibrate=calibrate_outputs),
        out_shape=jax.ShapeDtypeStruct((C_pad, C_pad), jnp.bfloat16),
        grid=(nI, nI, nK),
        in_specs=[
            pl.BlockSpec((TC, TK), lambda i, j, k: (i, k)),
            pl.BlockSpec((TC, TK), lambda i, j, k: (j, k)),
        ],
        out_specs=pl.BlockSpec((TC, TC), lambda i, j, k: (i, j)),
        scratch_shapes=[
            pltpu.VMEM((TC, TC), jnp.float32),     # Gram accumulator
            pltpu.VMEM((TC, 1), jnp.float32),      # sq row norms (block i)
            pltpu.VMEM((1, TC), jnp.float32),      # sq row norms (block j)
        ],
        compiler_params=pltpu.CompilerParams(
            dimension_semantics=("parallel", "parallel", "arbitrary"),
            vmem_limit_bytes=budget),
        cost_estimate=pl.CostEstimate(
            flops=2 * C_pad * C_pad * D_pad + 4 * C_pad * D_pad * nI,
            transcendentals=(2 * C_pad * nI) if calibrate_outputs else 0,
            bytes_accessed=2 * C_pad * D_pad * 4 * nI + C_pad * C_pad * 2),
    )(W_p, W_p)

    # -- Stage 2: per-sample margin ratio, batch-tiled "parallel" grid. -------
    nb = B_pad // TB
    ncol = C_pad // tcc
    if ncol == 1:
        # Whole-array VMEM residency: a single copy of D2 stays in VMEM for the
        # entire grid (the single-buffering the review asked for; no 2x blocked
        # double-buffer of a block whose index never changes).
        d2_spec = pl.BlockSpec(memory_space=pltpu.MemorySpace.VMEM)
    else:
        # Stream D2 in (tcc, C_pad) row blocks (double-buffered) when the full
        # matrix does not fit the per-generation VMEM budget (e.g. v7x, big C).
        d2_spec = pl.BlockSpec((tcc, C_pad), lambda i, j: (j, 0))

    inv_k = (1.0 / jnp.asarray(K, jnp.float32)).reshape(1)
    ratio_row = pl.pallas_call(
        functools.partial(_margin_ratio_kernel, tcc=tcc),
        out_shape=jax.ShapeDtypeStruct((1, B_pad), jnp.float32),
        grid=(nb, ncol),
        in_specs=[
            pl.BlockSpec(memory_space=pltpu.MemorySpace.SMEM),   # 1/K scalar
            pl.BlockSpec((C_pad, TB), lambda i, j: (0, i)),      # pred^T tile
            d2_spec,                                             # D2 (bf16)
        ],
        out_specs=pl.BlockSpec((1, TB), lambda i, j: (0, i)),    # lane-dense
        scratch_shapes=[
            pltpu.VMEM((1, TB), jnp.float32),                    # top value
            pltpu.VMEM((1, TB), jnp.int32),                      # top index
            pltpu.VMEM((1, TB), jnp.float32),                    # running min
        ],
        compiler_params=pltpu.CompilerParams(
            dimension_semantics=("parallel", "arbitrary"),
            vmem_limit_bytes=budget),
        cost_estimate=pl.CostEstimate(
            flops=2 * B_pad * C_pad * C_pad + 8 * B_pad * C_pad,
            transcendentals=B_pad * C_pad,
            bytes_accessed=(B_pad * C_pad * 4 + B_pad * 4
                            + (C_pad * C_pad * 2 if ncol == 1
                               else nb * C_pad * C_pad * 2))),
    )(inv_k, pred_t, d2)

    ratio = ratio_row[0, :B]
    if reduce == 'mean':
        return jnp.mean(ratio)
    elif reduce == 'min':
        return jnp.min(ratio)
    raise ValueError(f"unknown reduce: {reduce}")


# ---------------------------------------------------------------------------
# Plain-JAX mirror of the PyTorch forward (for validation).
# ---------------------------------------------------------------------------
def _reference(prediction, W, K, *, reduce='mean', calibrate_outputs=True):
    if calibrate_outputs:
        w_norm = jnp.linalg.norm(W, axis=1, keepdims=True)
        W = W / w_norm
    kW = K * W
    j0 = jnp.argmax(prediction, axis=1)
    y0 = jnp.max(prediction, axis=1)
    kW_j = kW[j0]                                           # [B, D]
    kW_ij = kW_j[:, :, None] - kW.T[None, :, :]             # [B, D, C]
    Kij = jnp.linalg.norm(kW_ij, axis=1)                    # [B, C]
    margins = y0[:, None] - prediction
    margins = margins.at[jnp.arange(prediction.shape[0]), j0].set(jnp.inf)
    ratios = margins / Kij
    ratio = jnp.min(ratios, axis=1)
    return jnp.mean(ratio) if reduce == 'mean' else jnp.min(ratio)


if __name__ == "__main__":
    key = jax.random.PRNGKey(0)

    # Synthetic Lipschitz bookkeeping (MarginRatio.__init__ / forward scalars).
    data_std = [0.5, 0.25, 1.0]
    data_scaling = 1.0 / min(data_std)        # 1 / min(data_std)
    Kfc = 2.0                                 # fc.estimate(...)
    K_model = 6.0                             # model.lipschitz_estimate(...)
    K = jnp.float32(K_model / Kfc * data_scaling)

    configs = [
        (8, 16, 32),      # tiny: single tile everywhere
        (300, 40, 600),   # exercises batch tiling, D-chunk accumulation, padding
    ]
    for (B, C, D) in configs:
        kp, kw, key = jax.random.split(key, 3)
        prediction = jax.random.normal(kp, (B, C), dtype=jnp.float32)
        W = 0.1 * jax.random.normal(kw, (C, D), dtype=jnp.float32)

        for reduce in ('mean', 'min'):
            for calib in (True, False):
                out = margin_ratio(prediction, W, K, reduce=reduce,
                                   calibrate_outputs=calib)
                out = jax.block_until_ready(out)
                ref = _reference(prediction, W, K, reduce=reduce,
                                 calibrate_outputs=calib)
                # D2 is stored in bf16 for the MXU gather -> ~1e-3 rel. tolerance.
                assert jnp.allclose(out, ref, rtol=5e-3, atol=1e-5), (
                    B, C, D, reduce, calib, out, ref)

    print("KERNEL_OK")
</pallas_src>

<mosaic_0001>
module attributes {stable_mosaic.version = 11 : i64} {
  func.func @_weight_dist2_kernel(%arg0: i32, %arg1: i32, %arg2: i32, %arg3: memref<128x128xf32, #tpu.memory_space<vmem>>, %arg4: memref<128x128xf32, #tpu.memory_space<vmem>>, %arg5: memref<128x128xbf16, #tpu.memory_space<vmem>>, %arg6: memref<128x128xf32, #tpu.memory_space<vmem>>, %arg7: memref<128x1xf32, #tpu.memory_space<vmem>>, %arg8: memref<1x128xf32, #tpu.memory_space<vmem>>) attributes {dimension_semantics = [#tpu.dimension_semantics<parallel>, #tpu.dimension_semantics<parallel>, #tpu.dimension_semantics<arbitrary>], iteration_bounds = array<i64: 1, 1, 1>, scalar_prefetch = 0 : i64, scratch_operands = 3 : i64, tpu.core_type = #tpu.core_type<tc>, window_params = [{transform_indices = @transform_0, window_bounds = array<i64: 128, 128>}, {transform_indices = @transform_1, window_bounds = array<i64: 128, 128>}, {transform_indices = @transform_2, window_bounds = array<i64: 128, 128>}]} {
    %c0_i32 = arith.constant 0 : i32
    %0 = arith.cmpi eq, %arg2, %c0_i32 : i32
    %1 = arith.extui %0 : i1 to i32
    %c0_i32_0 = arith.constant 0 : i32
    %2 = arith.cmpi ne, %1, %c0_i32_0 : i32
    scf.if %2 {
      %cst_21 = arith.constant 0.000000e+00 : f32
      %23 = vector.broadcast %cst_21 : f32 to vector<128x128xf32>
      %c0_22 = arith.constant 0 : index
      %c0_23 = arith.constant 0 : index
      %24 = vector.load %arg6[%c0_22, %c0_23] : memref<128x128xf32, #tpu.memory_space<vmem>>, vector<128x128xf32>
      tpu.vector_store %arg6[%c0_22, %c0_23], %23 {strides = array<i32>} : memref<128x128xf32, #tpu.memory_space<vmem>>, vector<128x128xf32>,
      %cst_24 = arith.constant 0.000000e+00 : f32
      %25 = vector.broadcast %cst_24 : f32 to vector<128x1xf32>
      %c0_25 = arith.constant 0 : index
      %c0_26 = arith.constant 0 : index
      %26 = vector.load %arg7[%c0_25, %c0_26] : memref<128x1xf32, #tpu.memory_space<vmem>>, vector<128x1xf32>
      tpu.vector_store %arg7[%c0_25, %c0_26], %25 {strides = array<i32>} : memref<128x1xf32, #tpu.memory_space<vmem>>, vector<128x1xf32>,
      %cst_27 = arith.constant 0.000000e+00 : f32
      %27 = vector.broadcast %cst_27 : f32 to vector<1x128xf32>
      %c0_28 = arith.constant 0 : index
      %c0_29 = arith.constant 0 : index
      %28 = vector.load %arg8[%c0_28, %c0_29] : memref<1x128xf32, #tpu.memory_space<vmem>>, vector<1x128xf32>
      tpu.vector_store %arg8[%c0_28, %c0_29], %27 {strides = array<i32>} : memref<1x128xf32, #tpu.memory_space<vmem>>, vector<1x128xf32>,
    } else {
    }
    %c0 = arith.constant 0 : index
    %c0_1 = arith.constant 0 : index
    %3 = vector.load %arg3[%c0, %c0_1] : memref<128x128xf32, #tpu.memory_space<vmem>>, vector<128x128xf32>
    %c0_2 = arith.constant 0 : index
    %c0_3 = arith.constant 0 : index
    %4 = vector.load %arg4[%c0_2, %c0_3] : memref<128x128xf32, #tpu.memory_space<vmem>>, vector<128x128xf32>
    %c0_4 = arith.constant 0 : index
    %c0_5 = arith.constant 0 : index
    %5 = vector.load %arg6[%c0_4, %c0_5] : memref<128x128xf32, #tpu.memory_space<vmem>>, vector<128x128xf32>
    %cst = arith.constant dense<0.000000e+00> : vector<128x128xf32>
    %6 = tpu.matmul %3, %4, %cst {dimension_numbers = #tpu.dot_dimension_numbers<[1], [1], [0], [0], [0, 0, 1, 0], [], []>} : vector<128x128xf32>, vector<128x128xf32>, vector<128x128xf32> -> vector<128x128xf32>
    %7 = arith.addf %5, %6 : vector<128x128xf32>
    %c0_6 = arith.constant 0 : index
    %c0_7 = arith.constant 0 : index
    %8 = vector.load %arg6[%c0_6, %c0_7] : memref<128x128xf32, #tpu.memory_space<vmem>>, vector<128x128xf32>
    tpu.vector_store %arg6[%c0_6, %c0_7], %7 {strides = array<i32>} : memref<128x128xf32, #tpu.memory_space<vmem>>, vector<128x128xf32>,
    %cst_8 = arith.constant 1.000000e+00 : f32
    %9 = vector.broadcast %cst_8 : f32 to vector<1x128xf32>
    %c0_9 = arith.constant 0 : index
    %c0_10 = arith.constant 0 : index
    %10 = vector.load %arg7[%c0_9, %c0_10] : memref<128x1xf32, #tpu.memory_space<vmem>>, vector<128x1xf32>
    %11 = arith.mulf %3, %3 : vector<128x128xf32>
    %cst_11 = arith.constant dense<0.000000e+00> : vector<128x1xf32>
    %12 = tpu.matmul %11, %9, %cst_11 {dimension_numbers = #tpu.dot_dimension_numbers<[1], [1], [0], [0], [0, 0, 1, 0], [], []>} : vector<128x128xf32>, vector<1x128xf32>, vector<128x1xf32> -> vector<128x1xf32>
    %13 = arith.addf %10, %12 : vector<128x1xf32>
    %c0_12 = arith.constant 0 : index
    %c0_13 = arith.constant 0 : index
    %14 = vector.load %arg7[%c0_12, %c0_13] : memref<128x1xf32, #tpu.memory_space<vmem>>, vector<128x1xf32>
    tpu.vector_store %arg7[%c0_12, %c0_13], %13 {strides = array<i32>} : memref<128x1xf32, #tpu.memory_space<vmem>>, vector<128x1xf32>,
    %c0_14 = arith.constant 0 : index
    %c0_15 = arith.constant 0 : index
    %15 = vector.load %arg8[%c0_14, %c0_15] : memref<1x128xf32, #tpu.memory_space<vmem>>, vector<1x128xf32>
    %16 = arith.mulf %4, %4 : vector<128x128xf32>
    %cst_16 = arith.constant dense<0.000000e+00> : vector<1x128xf32>
    %17 = tpu.matmul %9, %16, %cst_16 {dimension_numbers = #tpu.dot_dimension_numbers<[1], [1], [0], [0], [0, 0, 1, 0], [], []>} : vector<1x128xf32>, vector<128x128xf32>, vector<1x128xf32> -> vector<1x128xf32>
    %18 = arith.addf %15, %17 : vector<1x128xf32>
    %c0_17 = arith.constant 0 : index
    %c0_18 = arith.constant 0 : index
    %19 = vector.load %arg8[%c0_17, %c0_18] : memref<1x128xf32, #tpu.memory_space<vmem>>, vector<1x128xf32>
    tpu.vector_store %arg8[%c0_17, %c0_18], %18 {strides = array<i32>} : memref<1x128xf32, #tpu.memory_space<vmem>>, vector<1x128xf32>,
    %c0_i32_19 = arith.constant 0 : i32
    %20 = arith.cmpi eq, %arg2, %c0_i32_19 : i32
    %21 = arith.extui %20 : i1 to i32
    %c0_i32_20 = arith.constant 0 : i32
    %22 = arith.cmpi ne, %21, %c0_i32_20 : i32
    scf.if %22 {
      %c0_21 = arith.constant 0 : index
      %c0_22 = arith.constant 0 : index
      %23 = vector.load %arg6[%c0_21, %c0_22] : memref<128x128xf32, #tpu.memory_space<vmem>>, vector<128x128xf32>
      %c0_23 = arith.constant 0 : index
      %c0_24 = arith.constant 0 : index
      %24 = vector.load %arg7[%c0_23, %c0_24] : memref<128x1xf32, #tpu.memory_space<vmem>>, vector<128x1xf32>
      %c0_25 = arith.constant 0 : index
      %c0_26 = arith.constant 0 : index
      %25 = vector.load %arg8[%c0_25, %c0_26] : memref<1x128xf32, #tpu.memory_space<vmem>>, vector<1x128xf32>
      %cst_27 = arith.constant 1.000000e-30 : f32
      %26 = vector.broadcast %cst_27 : f32 to vector<128x1xf32>
      %27 = arith.maximumf %24, %26 : vector<128x1xf32>
      %28 = math.rsqrt %27 : vector<128x1xf32>
      %cst_28 = arith.constant 1.000000e-30 : f32
      %29 = vector.broadcast %cst_28 : f32 to vector<1x128xf32>
      %30 = arith.maximumf %25, %29 : vector<1x128xf32>
      %31 = math.rsqrt %30 : vector<1x128xf32>
      %cst_29 = arith.constant 2.000000e+00 : f32
      %32 = vector.broadcast %cst_29 : f32 to vector<128x128xf32>
      %33 = arith.mulf %32, %23 : vector<128x128xf32>
      %34 = vector.broadcast %28 : vector<128x1xf32> to vector<128x128xf32>
      %35 = arith.mulf %33, %34 : vector<128x128xf32>
      %36 = vector.broadcast %31 : vector<1x128xf32> to vector<128x128xf32>
      %37 = arith.mulf %35, %36 : vector<128x128xf32>
      %cst_30 = arith.constant 2.000000e+00 : f32
      %38 = vector.broadcast %cst_30 : f32 to vector<128x128xf32>
      %39 = arith.subf %38, %37 : vector<128x128xf32>
      %cst_31 = arith.constant 0.000000e+00 : f32
      %40 = vector.broadcast %cst_31 : f32 to vector<128x128xf32>
      %41 = arith.maximumf %39, %40 : vector<128x128xf32>
      %42 = arith.truncf %41 : vector<128x128xf32> to vector<128x128xbf16>
      %c0_32 = arith.constant 0 : index
      %c0_33 = arith.constant 0 : index
      %43 = vector.load %arg5[%c0_32, %c0_33] : memref<128x128xbf16, #tpu.memory_space<vmem>>, vector<128x128xbf16>
      tpu.vector_store %arg5[%c0_32, %c0_33], %42 {strides = array<i32>} : memref<128x128xbf16, #tpu.memory_space<vmem>>, vector<128x128xbf16>,
    } else {
    }
    return
  }
  func.func @transform_0(%arg0: i32, %arg1: i32, %arg2: i32) -> (i32, i32) {
    %c0_i32 = arith.constant 0 : i32
    return %arg0, %arg2 : i32, i32
  }
  func.func @transform_1(%arg0: i32, %arg1: i32, %arg2: i32) -> (i32, i32) {
    %c0_i32 = arith.constant 0 : i32
    return %arg1, %arg2 : i32, i32
  }
  func.func @transform_2(%arg0: i32, %arg1: i32, %arg2: i32) -> (i32, i32) {
    %c0_i32 = arith.constant 0 : i32
    return %arg0, %arg1 : i32, i32
  }
}

</mosaic_0001>

<bundles_post_ra>
// kernel: tpu_custom_call.1
= control target key start
LH: loop header
LB: loop body
LE: loop exit
PB: predicated region body
PF: predicated region fallthrough
CT: control target
= control target key end

     0   :  { %7 = vsyncpa [#allocation6], 0  ;;  %s1423_s0 = inlined_call_operand.hbm [shape: f32[128,128], index: 0, kind: input, shape index: {}]   ;;  %s1424_s1 = inlined_call_operand.hbm [shape: f32[128,128], index: 1, kind: input, shape index: {}]   ;;  %s1425_s2 = inlined_call_operand.hbm [shape: bf16[128,128], index: 2, kind: output, shape index: {}]  }
   0x1   :  { %8 = vsyncpa [#allocation9], 0 }
   0x2   :  { %9 = vsyncpa [#allocation7], 0  ;;  %s1218_s9 = smov [#allocation5]   ;;  %s1146_s13 = scalar_lea.hbm %s1423_s0, 2048 }
   0x3   :  { %s15_s10 = sshll.u32 %s1218_s9, 4  ;;  %p1147_p0 = scmp.ne.s32.totalorder %s1423_s0, %s1146_s13  ;;  %s16_s10 = int_to_ptr.vmem [resolvable:$true] %s15_s10 }
   0x4   :  { %p1150_p1 = scmp.lt.u32.totalorder %s1146_s13, %s1423_s0 }
   0x6   :  { %p1152_p2 = pnand %p1150_p1, %p1147_p0 }
   0x8   :  { %1155 = shalt.err (!%p1152_p2)
}
   0x9   :  { %s1156_s18 = scalar_lea.vmem %s16_s10, 2048  ;;  %p1161_p4 = scmp.lt.s32.totalorder %s16_s10, %s16_s10 }
   0xa   :  { %p1157_p3 = scmp.ne.s32.totalorder %s16_s10, %s1156_s18  ;;  %p1162_p5 = scmp.lt.s32.totalorder %s1156_s18, %s1156_s18 }
   0xc   :  { %p1163_p6 = por %p1162_p5, %p1161_p4 }
   0xe   :  { %p1164_p7 = pnand %p1163_p6, %p1157_p3 }
  0x10   :  { %1167 = shalt.err (!%p1164_p7)
}
  0x11   :  { %s1219_s19 = smov 128   ;;  %s1220_s20 = smov 8  }
  0x12   :  { %21 = dma.hbm_to_vmem [thread:$0]  %s1423_s0, 2048, %s16_s10, [#allocation6], %s1219_s19, %s1219_s19, %s1220_s20  }
  0x13   :  { %s1221_s23 = smov [#allocation8]   ;;  %s1168_s27 = scalar_lea.hbm %s1424_s1, 2048 }
  0x14   :  { %s27_s24 = sshll.u32 %s1221_s23, 4  ;;  %p1169_p8 = scmp.ne.s32.totalorder %s1424_s1, %s1168_s27  ;;  %s28_s24 = int_to_ptr.vmem [resolvable:$true] %s27_s24 }
  0x15   :  { %p1172_p9 = scmp.lt.u32.totalorder %s1168_s27, %s1424_s1 }
  0x17   :  { %p1174_p10 = pnand %p1172_p9, %p1169_p8 }
  0x19   :  { %1177 = shalt.err (!%p1174_p10)
}
  0x1a   :  { %s1178_s4 = scalar_lea.vmem %s28_s24, 2048  ;;  %p1183_p12 = scmp.lt.s32.totalorder %s28_s24, %s28_s24 }
  0x1b   :  { %p1179_p11 = scmp.ne.s32.totalorder %s28_s24, %s1178_s4  ;;  %p1184_p13 = scmp.lt.s32.totalorder %s1178_s4, %s1178_s4 }
  0x1d   :  { %p1185_p0 = por %p1184_p13, %p1183_p12 }
  0x1f   :  { %p1186_p1 = pnand %p1185_p0, %p1179_p11 }
  0x21   :  { %1189 = shalt.err (!%p1186_p1)
}
  0x22   :  { %33 = dma.hbm_to_vmem [thread:$0]  %s1424_s1, 2048, %s28_s24, [#allocation9], %s1219_s19, %s1219_s19, %s1220_s20  }
  0x23   :  { %1212 = dma.done.wait [#allocation6], 2048  }
  0x24   :  { %1213 = vsyncadd [#allocation6], 4294965248 }
  0x25   :  { %1214 = dma.done.wait [#allocation9], 2048  }
  0x26   :  { %1215 = vsyncadd [#allocation9], 4294965248  ;;  %v1222_v0 = vmov 0.0|0.0   ;;  %vm1223_vm0 = vmmov 0   ;;  %v1224_v1 = vmov 0.0   ;;  %vm60_vm1 = vcmask 7168  }
  0x27   :  { %1074 = vmatprep.subr.bf16.mxu1 %v1222_v0  ;;  %1039 = vmatprep.mubr.msk.f32.mxu1 %vm1223_vm0, %v1224_v1  ;;  %77 = vst [vmem:[#allocation4] sm:$0x1] %v1224_v1  ;;  %63 = vst.msk [vmem:[#allocation3 + $0x10] sm:$0xff] %vm60_vm1, %v1224_v1  ;;  %v1286_v2 = vld [vmem:[#allocation5 + $0x10] sm:$0xff]  ;;  %v78_v3 = vld [vmem:[#allocation5] sm:$0xff]  ;;  %s1227_s1 = smov [#allocation10]  }
  0x28   :  { %61 = vst.msk [vmem:[#allocation3] sm:$0xff] %vm60_vm1, %v1224_v1  ;;  %62 = vst.msk [vmem:[#allocation3 + $0x8] sm:$0xff] %vm60_vm1, %v1224_v1  ;;  %v94_v4 = vld [vmem:[#allocation8] sm:$0xff]  ;;  %v321_v5 = vmul.f32 %v1286_v2, %v1286_v2  ;;  %v319_v6 = vmul.f32 %v78_v3, %v78_v3  ;;  %v95_v7 = vld [vmem:[#allocation8 + $0x8] sm:$0xff]  ;;  %983 = vmatprep.mubr.f32.mxu0 %v78_v3  ;;  %s810_s6 = sshll.u32 %s1227_s1, 4  ;;  %s811_s6 = int_to_ptr.vmem [resolvable:$true] %s810_s6 }
  0x29   :  { %64 = vst.msk [vmem:[#allocation3 + $0x18] sm:$0xff] %vm60_vm1, %v1224_v1  ;;  %65 = vst.msk [vmem:[#allocation3 + $0x20] sm:$0xff] %vm60_vm1, %v1224_v1  ;;  %v401_v8 = vmul.f32 %v94_v4, %v94_v4  ;;  %v1290_v9 = vld [vmem:[#allocation5 + $0x18] sm:$0xff]  ;;  %v1292_v10 = vld [vmem:[#allocation5 + $0x8] sm:$0xff]  ;;  %v402_v11 = vmul.f32 %v95_v7, %v95_v7  ;;  %v1042_v12 = vpack.c.bf16 %v95_v7, %v94_v4  ;;  %v1225_v7 = vmov 0   ;;  %s1190_s7 = scalar_lea.vmem %s811_s6, 1024  ;;  %p1195_p3 = scmp.lt.s32.totalorder %s811_s6, %s811_s6 }
  0x2a   :  { %66 = vst.msk [vmem:[#allocation3 + $0x28] sm:$0xff] %vm60_vm1, %v1224_v1  ;;  %67 = vst.msk [vmem:[#allocation3 + $0x30] sm:$0xff] %vm60_vm1, %v1224_v1  ;;  %339 = vadd.xlane.f32.xlu1 %v321_v5  ;;  %335 = vadd.xlane.f32.xlu0 %v319_v6  ;;  %v322_v13 = vmul.f32 %v1290_v9, %v1290_v9  ;;  %v320_v14 = vmul.f32 %v1292_v10, %v1292_v10  ;;  %v96_v15 = vld [vmem:[#allocation8 + $0x10] sm:$0xff]  ;;  %v97_v16 = vld [vmem:[#allocation8 + $0x18] sm:$0xff]  ;;  %p1191_p2 = scmp.ne.s32.totalorder %s811_s6, %s1190_s7  ;;  %p1196_p4 = scmp.lt.s32.totalorder %s1190_s7, %s1190_s7 }
  0x2b   :  { %68 = vst.msk [vmem:[#allocation3 + $0x38] sm:$0xff] %vm60_vm1, %v1224_v1  ;;  %69 = vst.msk [vmem:[#allocation3 + $0x40] sm:$0xff] %vm60_vm1, %v1224_v1  ;;  %v1075_v17 = vpack.c.bf16 %v402_v11, %v401_v8  ;;  %v1298_v18 = vld [vmem:[#allocation5 + $0x28] sm:$0xff]  ;;  %1043 = vmatprep.subr.bf16.mxu0 %v1042_v12  ;;  %v1300_v19 = vld [vmem:[#allocation5 + $0x20] sm:$0xff]  ;;  %v403_v20 = vmul.f32 %v96_v15, %v96_v15  ;;  %v404_v21 = vmul.f32 %v97_v16, %v97_v16 }
  0x2c   :  { %70 = vst.msk [vmem:[#allocation3 + $0x48] sm:$0xff] %vm60_vm1, %v1224_v1  ;;  %71 = vst.msk [vmem:[#allocation3 + $0x50] sm:$0xff] %vm60_vm1, %v1224_v1  ;;  %1045 = vmatpush3.bf16.xpose.msra.mxu0 %v1042_v12  ;;  %v1046_v22 = vpack.c.bf16 %v97_v16, %v96_v15  ;;  %v324_v23 = vmul.f32 %v1298_v18, %v1298_v18  ;;  %v323_v24 = vmul.f32 %v1300_v19, %v1300_v19  ;;  %v1307_v25 = vld [vmem:[#allocation5 + $0x38] sm:$0xff]  ;;  %v98_v26 = vld [vmem:[#allocation8 + $0x20] sm:$0xff]  ;;  %p1197_p5 = por %p1196_p4, %p1195_p3 }
  0x2d   :  { %72 = vst.msk [vmem:[#allocation3 + $0x58] sm:$0xff] %vm60_vm1, %v1224_v1  ;;  %73 = vst.msk [vmem:[#allocation3 + $0x60] sm:$0xff] %vm60_vm1, %v1224_v1  ;;  %1076 = vmatpush3.bf16.xpose.msra.mxu1 %v1075_v17  ;;  %v99_v27 = vld [vmem:[#allocation8 + $0x28] sm:$0xff]  ;;  %v1309_v28 = vld [vmem:[#allocation5 + $0x30] sm:$0xff]  ;;  %v1078_v29 = vpack.c.bf16 %v404_v21, %v403_v20  ;;  %v326_v31 = vmul.f32 %v1307_v25, %v1307_v25  ;;  %v405_v35 = vmul.f32 %v98_v26, %v98_v26 }
  0x2e   :  { %74 = vst.msk [vmem:[#allocation3 + $0x68] sm:$0xff] %vm60_vm1, %v1224_v1  ;;  %75 = vst.msk [vmem:[#allocation3 + $0x70] sm:$0xff] %vm60_vm1, %v1224_v1  ;;  %341 = vadd.xlane.f32.xlu1 %v322_v13  ;;  %337 = vadd.xlane.f32.xlu0 %v320_v14  ;;  %v1050_v30 = vpack.c.bf16 %v99_v27, %v98_v26  ;;  %v1313_v32 = vld [vmem:[#allocation5 + $0x48] sm:$0xff]  ;;  %v325_v33 = vmul.f32 %v1309_v28, %v1309_v28  ;;  %v1317_v34 = vld [vmem:[#allocation5 + $0x40] sm:$0xff]  ;;  %v1226_v26 = vmov 1.0   ;;  %p1198_p6 = pnand %p1197_p5, %p1191_p2 }
  0x2f   :  { %76 = vst.msk [vmem:[#allocation3 + $0x78] sm:$0xff] %vm60_vm1, %v1224_v1  ;;  %1077 = vmatprep.subr.bf16.mxu1 %v1222_v0  ;;  %1047 = vmatprep.subr.bf16.mxu0 %v1046_v22  ;;  %v406_v36 = vmul.f32 %v99_v27, %v99_v27  ;;  %v328_v37 = vmul.f32 %v1313_v32, %v1313_v32  ;;  %v1322_v38 = vld [vmem:[#allocation5 + $0x58] sm:$0xff]  ;;  %v100_v40 = vld [vmem:[#allocation8 + $0x30] sm:$0xff]  ;;  %v1330_v46 = vld [vmem:[#allocation5 + $0x68] sm:$0xff] }
  0x30   :  { %v327_v39 = vmul.f32 %v1317_v34, %v1317_v34  ;;  %v101_v41 = vld [vmem:[#allocation8 + $0x38] sm:$0xff]  ;;  %v1326_v42 = vld [vmem:[#allocation5 + $0x50] sm:$0xff]  ;;  %v330_v45 = vmul.f32 %v1322_v38, %v1322_v38  ;;  %v1334_v48 = vld [vmem:[#allocation5 + $0x60] sm:$0xff]  ;;  %v407_v49 = vmul.f32 %v100_v40, %v100_v40  ;;  %v332_v51 = vmul.f32 %v1330_v46, %v1330_v46  ;;  %1110 = vset.pattern.permute.xlu0 %v1225_v7 }
  0x31   :  { %v1081_v43 = vpack.c.bf16 %v406_v36, %v405_v35  ;;  %v1054_v44 = vpack.c.bf16 %v101_v41, %v100_v40  ;;  %v329_v47 = vmul.f32 %v1326_v42, %v1326_v42  ;;  %v408_v50 = vmul.f32 %v101_v41, %v101_v41  ;;  %v1339_v52 = vld [vmem:[#allocation5 + $0x78] sm:$0xff]  ;;  %v102_v54 = vld [vmem:[#allocation8 + $0x40] sm:$0xff]  ;;  %v103_v55 = vld [vmem:[#allocation8 + $0x48] sm:$0xff]  ;;  %1111 = vset.pattern.permute.xlu1 %v1225_v7 }
  0x32   :  { %345 = vadd.xlane.f32.xlu1 %v324_v23  ;;  %343 = vadd.xlane.f32.xlu0 %v323_v24  ;;  %v331_v53 = vmul.f32 %v1334_v48, %v1334_v48  ;;  %v1343_v56 = vld [vmem:[#allocation5 + $0x70] sm:$0xff]  ;;  %v1058_v58 = vpack.c.bf16 %v103_v55, %v102_v54  ;;  %v334_v59 = vmul.f32 %v1339_v52, %v1339_v52  ;;  %v105_v1 = vld [vmem:[#allocation8 + $0x58] sm:$0xff]  ;;  %v106_v8 = vld [vmem:[#allocation8 + $0x60] sm:$0xff] }
  0x33   :  { %v1084_v57 = vpack.c.bf16 %v408_v50, %v407_v49  ;;  %v333_v60 = vmul.f32 %v1343_v56, %v1343_v56  ;;  %v409_v61 = vmul.f32 %v102_v54, %v102_v54  ;;  %v410_v62 = vmul.f32 %v103_v55, %v103_v55  ;;  %v104_v63 = vld [vmem:[#allocation8 + $0x50] sm:$0xff]  ;;  %v107_v11 = vld [vmem:[#allocation8 + $0x68] sm:$0xff]  ;;  %v109_v17 = vld [vmem:[#allocation8 + $0x78] sm:$0xff] }
  0x34   :  { %1049 = vmatpush3.bf16.xpose.msra.mxu0 %v1046_v22  ;;  %v1062_v4 = vpack.c.bf16 %v105_v1, %v104_v63  ;;  %v411_v5 = vmul.f32 %v104_v63, %v104_v63  ;;  %v412_v6 = vmul.f32 %v105_v1, %v105_v1  ;;  %v1066_v13 = vpack.c.bf16 %v107_v11, %v106_v8  ;;  %v108_v16 = vld [vmem:[#allocation8 + $0x70] sm:$0xff]  ;;  %v304_v27 = vld [vmem:[#allocation3 + $0x8] sm:$0xff]  ;;  %v311_v50 = vld [vmem:[#allocation3 + $0x40] sm:$0xff] }
  0x35   :  { %1079 = vmatpush3.bf16.xpose.msra.mxu1 %v1078_v29  ;;  %1051 = vmatprep.subr.bf16.mxu0 %v1050_v30  ;;  %v1087_v3 = vpack.c.bf16 %v410_v62, %v409_v61  ;;  %v413_v14 = vmul.f32 %v106_v8, %v106_v8  ;;  %v414_v15 = vmul.f32 %v107_v11, %v107_v11  ;;  %v309_v40 = vld [vmem:[#allocation3 + $0x30] sm:$0xff]  ;;  %v316_v1 = vld [vmem:[#allocation3 + $0x68] sm:$0xff] }
  0x36   :  { %349 = vadd.xlane.f32.xlu1 %v326_v31  ;;  %1080 = vmatprep.subr.bf16.mxu1 %v1222_v0  ;;  %v1090_v12 = vpack.c.bf16 %v412_v6, %v411_v5  ;;  %v1070_v21 = vpack.c.bf16 %v109_v17, %v108_v16  ;;  %v415_v22 = vmul.f32 %v108_v16, %v108_v16  ;;  %v315_v5 = vld [vmem:[#allocation3 + $0x60] sm:$0xff] }
  0x37   :  { %347 = vadd.xlane.f32.xlu0 %v325_v33  ;;  %v1093_v20 = vpack.c.bf16 %v414_v15, %v413_v14  ;;  %v416_v23 = vmul.f32 %v109_v17, %v109_v17  ;;  %v307_v33 = vld [vmem:[#allocation3 + $0x20] sm:$0xff] }
  0x39   :  { %v1096_v24 = vpack.c.bf16 %v416_v23, %v415_v22 }
  0x3a   :  { %353 = vadd.xlane.f32.xlu1 %v328_v37 }
  0x3b   :  { %351 = vadd.xlane.f32.xlu0 %v327_v39 }
  0x3c   :  { %1053 = vmatpush3.bf16.xpose.msra.mxu0 %v1050_v30 }
  0x3d   :  { %1082 = vmatpush3.bf16.xpose.msra.mxu1 %v1081_v43  ;;  %1055 = vmatprep.subr.bf16.mxu0 %v1054_v44 }
  0x3e   :  { %357 = vadd.xlane.f32.xlu1 %v330_v45  ;;  %1083 = vmatprep.subr.bf16.mxu1 %v1222_v0 }
  0x3f   :  { %355 = vadd.xlane.f32.xlu0 %v329_v47 }
  0x42   :  { %361 = vadd.xlane.f32.xlu1 %v332_v51 }
  0x43   :  { %359 = vadd.xlane.f32.xlu0 %v331_v53 }
  0x44   :  { %1057 = vmatpush3.bf16.xpose.msra.mxu0 %v1054_v44 }
  0x45   :  { %1085 = vmatpush3.bf16.xpose.msra.mxu1 %v1084_v57  ;;  %1059 = vmatprep.subr.bf16.mxu0 %v1058_v58 }
  0x46   :  { %365 = vadd.xlane.f32.xlu1 %v334_v59  ;;  %1086 = vmatprep.subr.bf16.mxu1 %v1222_v0 }
  0x47   :  { %363 = vadd.xlane.f32.xlu0 %v333_v60 }
  0x4c   :  { %1061 = vmatpush3.bf16.xpose.msra.mxu0 %v1058_v58  ;;  %v313_v58 = vld [vmem:[#allocation3 + $0x50] sm:$0xff] }
  0x4d   :  { %1088 = vmatpush3.bf16.xpose.msra.mxu1 %v1087_v3  ;;  %1063 = vmatprep.subr.bf16.mxu0 %v1062_v4 }
  0x4e   :  { %1089 = vmatprep.subr.bf16.mxu1 %v1222_v0 }
  0x54   :  { %1065 = vmatpush3.bf16.xpose.msra.mxu0 %v1062_v4 }
  0x55   :  { %1091 = vmatpush3.bf16.xpose.msra.mxu1 %v1090_v12  ;;  %1067 = vmatprep.subr.bf16.mxu0 %v1066_v13 }
  0x56   :  { %1092 = vmatprep.subr.bf16.mxu1 %v1222_v0 }
  0x5c   :  { %1069 = vmatpush3.bf16.xpose.msra.mxu0 %v1066_v13  ;;  %v318_v13 = vld [vmem:[#allocation3 + $0x78] sm:$0xff] }
  0x5d   :  { %1094 = vmatpush3.bf16.xpose.msra.mxu1 %v1093_v20  ;;  %1071 = vmatprep.subr.bf16.mxu0 %v1070_v21  ;;  %v317_v20 = vld [vmem:[#allocation3 + $0x70] sm:$0xff] }
  0x5e   :  { %1095 = vmatprep.subr.bf16.mxu1 %v1222_v0  ;;  %v305_v0 = vld [vmem:[#allocation3 + $0x10] sm:$0xff] }
  0x64   :  { %1073 = vmatpush3.bf16.xpose.msra.mxu0 %v1070_v21 }
  0x65   :  { %1097 = vmatpush3.bf16.xpose.msra.mxu1 %v1096_v24 }
  0x6b   :  { %984 = vmatmul.mubr.f32.vlgmr.msra.gmra.mrb[0].mxu0 %v1292_v10 }
  0x6c   :  { %1040 = vmatmul.mubr.f32.vlgmr.msra.gmra.mrb[0].mxu1 %v1226_v26  ;;  %986 = vmatprep.mubr.f32.mxu0 %v1286_v2  ;;  %v303_v2 = vld [vmem:[#allocation3] sm:$0xff] }
  0x6f   :  { %987 = vmatmul.mubr.f32.gmra.mrb[2].mxu0 %v1290_v9 }
  0x70   :  { %989 = vmatprep.mubr.f32.mxu0 %v1300_v19 }
  0x73   :  { %990 = vmatmul.mubr.f32.gmra.mrb[4].mxu0 %v1298_v18 }
  0x74   :  { %992 = vmatprep.mubr.f32.mxu0 %v1309_v28 }
  0x77   :  { %993 = vmatmul.mubr.f32.gmra.mrb[6].mxu0 %v1307_v25  ;;  %v306_v25 = vld [vmem:[#allocation3 + $0x18] sm:$0xff] }
  0x78   :  { %995 = vmatprep.mubr.f32.mxu0 %v1317_v34 }
  0x7b   :  { %996 = vmatmul.mubr.f32.gmra.mrb[8].mxu0 %v1313_v32  ;;  %v308_v32 = vld [vmem:[#allocation3 + $0x28] sm:$0xff] }
  0x7c   :  { %998 = vmatprep.mubr.f32.mxu0 %v1326_v42 }
  0x7f   :  { %999 = vmatmul.mubr.f32.gmra.mrb[10].mxu0 %v1322_v38  ;;  %v310_v38 = vld [vmem:[#allocation3 + $0x38] sm:$0xff] }
  0x80   :  { %1001 = vmatprep.mubr.f32.mxu0 %v1334_v48 }
  0x83   :  { %1002 = vmatmul.mubr.f32.gmra.mrb[12].mxu0 %v1330_v46  ;;  %v312_v46 = vld [vmem:[#allocation3 + $0x48] sm:$0xff] }
  0x84   :  { %1004 = vmatprep.mubr.f32.mxu0 %v1343_v56  ;;  %v314_v56 = vld [vmem:[#allocation3 + $0x58] sm:$0xff] }
  0x87   :  { %1005 = vmatmul.mubr.f32.gmra.mrb[14].mxu0 %v1339_v52 }
  0xb7   :  { %v340_v9 = vpop.xlane.xlu1 %339  ;;  %v336_v10 = vpop.xlane.xlu0 %335 }
  0xb8   :  { %v369_v18 = vadd.f32 %v340_v9, %v305_v0  ;;  %v367_v19 = vadd.f32 %v336_v10, %v303_v2 }
  0xba   :  { %386 = vst.msk [vmem:[#allocation3 + $0x10] sm:$0xff] %vm60_vm1, %v369_v18  ;;  %384 = vst.msk [vmem:[#allocation3] sm:$0xff] %vm60_vm1, %v367_v19 }
  0xbb   :  { %v342_v28 = vpop.xlane.xlu1 %341  ;;  %v338_v29 = vpop.xlane.xlu0 %337 }
  0xbc   :  { %v370_v30 = vadd.f32 %v342_v28, %v306_v25  ;;  %v368_v31 = vadd.f32 %v338_v29, %v304_v27 }
  0xbe   :  { %387 = vst.msk [vmem:[#allocation3 + $0x18] sm:$0xff] %vm60_vm1, %v370_v30  ;;  %385 = vst.msk [vmem:[#allocation3 + $0x8] sm:$0xff] %vm60_vm1, %v368_v31 }
  0xbf   :  { %v346_v34 = vpop.xlane.xlu1 %345  ;;  %v344_v35 = vpop.xlane.xlu0 %343 }
  0xc0   :  { %v372_v36 = vadd.f32 %v346_v34, %v308_v32  ;;  %v371_v37 = vadd.f32 %v344_v35, %v307_v33 }
  0xc1   :  { %v508_v39 = vld [vmem:[#allocation3] sm:$0xff]  ;;  %v510_v43 = vld [vmem:[#allocation3 + $0x10] sm:$0xff] }
  0xc2   :  { %389 = vst.msk [vmem:[#allocation3 + $0x28] sm:$0xff] %vm60_vm1, %v372_v36  ;;  %388 = vst.msk [vmem:[#allocation3 + $0x20] sm:$0xff] %vm60_vm1, %v371_v37  ;;  %v525_v41 = vmax.f32 %v508_v39, 1e-30  ;;  %v527_v51 = vmax.f32 %v510_v43, 1e-30 }
  0xc3   :  { %v350_v42 = vpop.xlane.xlu1 %349 }
  0xc4   :  { %v374_v44 = vadd.f32 %v350_v42, %v310_v38  ;;  %v348_v45 = vpop.xlane.xlu0 %347  ;;  %1112 = vrsqrt.f32 %v525_v41 }
  0xc5   :  { %v373_v47 = vadd.f32 %v348_v45, %v309_v40  ;;  %v509_v48 = vld [vmem:[#allocation3 + $0x8] sm:$0xff]  ;;  %v511_v53 = vld [vmem:[#allocation3 + $0x18] sm:$0xff] }
  0xc6   :  { %391 = vst.msk [vmem:[#allocation3 + $0x38] sm:$0xff] %vm60_vm1, %v374_v44  ;;  %v526_v49 = vmax.f32 %v509_v48, 1e-30  ;;  %v528_v59 = vmax.f32 %v511_v53, 1e-30 }
  0xc7   :  { %v354_v52 = vpop.xlane.xlu1 %353  ;;  %390 = vst.msk [vmem:[#allocation3 + $0x30] sm:$0xff] %vm60_vm1, %v373_v47 }
  0xc8   :  { %v376_v54 = vadd.f32 %v354_v52, %v312_v46  ;;  %1114 = vrsqrt.f32 %v526_v49  ;;  %v352_v55 = vpop.xlane.xlu0 %351  ;;  %v400_v52 = vld [vmem:[#allocation4] sm:$0x1] }
  0xc9   :  { %v375_v57 = vadd.f32 %v352_v55, %v311_v50  ;;  %1116 = vrsqrt.f32 %v527_v51  ;;  %v512_v61 = vld [vmem:[#allocation3 + $0x20] sm:$0xff]  ;;  %v513_v8 = vld [vmem:[#allocation3 + $0x28] sm:$0xff] }
  0xca   :  { %393 = vst.msk [vmem:[#allocation3 + $0x48] sm:$0xff] %vm60_vm1, %v376_v54  ;;  %1118 = vrsqrt.f32 %v528_v59  ;;  %v529_v6 = vmax.f32 %v512_v61, 1e-30  ;;  %v530_v21 = vmax.f32 %v513_v8, 1e-30 }
  0xcb   :  { %v358_v60 = vpop.xlane.xlu1 %357  ;;  %392 = vst.msk [vmem:[#allocation3 + $0x40] sm:$0xff] %vm60_vm1, %v375_v57 }
  0xcc   :  { %v378_v62 = vadd.f32 %v358_v60, %v314_v56  ;;  %v356_v63 = vpop.xlane.xlu0 %355  ;;  %1120 = vrsqrt.f32 %v529_v6 }
  0xcd   :  { %v377_v3 = vadd.f32 %v356_v63, %v313_v58  ;;  %v515_v19 = vld [vmem:[#allocation3 + $0x38] sm:$0xff] }
  0xce   :  { %v1113_v4 = vpop.eup %1112  ;;  %395 = vst.msk [vmem:[#allocation3 + $0x58] sm:$0xff] %vm60_vm1, %v378_v62  ;;  %v514_v23 = vld [vmem:[#allocation3 + $0x30] sm:$0xff]  ;;  %v532_v29 = vmax.f32 %v515_v19, 1e-30 }
  0xcf   :  { %v362_v7 = vpop.xlane.xlu1 %361  ;;  %577 = vperm.xlu0 %1110, %v1113_v4   ;;  %394 = vst.msk [vmem:[#allocation3 + $0x50] sm:$0xff] %vm60_vm1, %v377_v3  ;;  %v531_v18 = vmax.f32 %v514_v23, 1e-30  ;;  %v672_v3 = vlaneseq }
  0xd0   :  { %v380_v11 = vadd.f32 %v362_v7, %v316_v1  ;;  %v360_v12 = vpop.xlane.xlu0 %359 }
  0xd1   :  { %v379_v14 = vadd.f32 %v360_v12, %v315_v5  ;;  %v517_v15 = vld [vmem:[#allocation3 + $0x48] sm:$0xff]  ;;  %v673_v6 = vshrl.u32 %v672_v3, 7 }
  0xd2   :  { %v1115_v16 = vpop.eup %1114  ;;  %397 = vst.msk [vmem:[#allocation3 + $0x68] sm:$0xff] %vm60_vm1, %v380_v11  ;;  %v534_v17 = vmax.f32 %v517_v15, 1e-30  ;;  %v516_v30 = vld [vmem:[#allocation3 + $0x40] sm:$0xff] }
  0xd3   :  { %v366_v22 = vpop.xlane.xlu1 %365  ;;  %582 = vperm.xlu1 %1111, %v1115_v16   ;;  %396 = vst.msk [vmem:[#allocation3 + $0x60] sm:$0xff] %vm60_vm1, %v379_v14  ;;  %v1117_v24 = vpop.eup %1116  ;;  %v533_v35 = vmax.f32 %v516_v30, 1e-30  ;;  %v674_v12 = vsub.s32 0, %v673_v6 }
  0xd4   :  { %v382_v26 = vadd.f32 %v366_v22, %v318_v13  ;;  %1122 = vrsqrt.f32 %v534_v17  ;;  %v364_v0 = vpop.xlane.xlu0 %363  ;;  %v1119_v25 = vpop.eup %1118 }
  0xd5   :  { %v381_v2 = vadd.f32 %v364_v0, %v317_v20  ;;  %v519_v9 = vld [vmem:[#allocation3 + $0x58] sm:$0xff]  ;;  %1124 = vrsqrt.f32 %v530_v21 }
  0xd6   :  { %399 = vst.msk [vmem:[#allocation3 + $0x78] sm:$0xff] %vm60_vm1, %v382_v26  ;;  %v536_v10 = vmax.f32 %v519_v9, 1e-30  ;;  %v1121_v31 = vpop.eup %1120  ;;  %v518_v36 = vld [vmem:[#allocation3 + $0x50] sm:$0xff] }
  0xd7   :  { %587 = vperm.xlu1 %1111, %v1117_v24   ;;  %398 = vst.msk [vmem:[#allocation3 + $0x70] sm:$0xff] %vm60_vm1, %v381_v2  ;;  %v535_v39 = vmax.f32 %v518_v36, 1e-30 }
  0xd8   :  { %1126 = vrsqrt.f32 %v536_v10 }
  0xd9   :  { %v521_v27 = vld [vmem:[#allocation3 + $0x68] sm:$0xff]  ;;  %1128 = vrsqrt.f32 %v531_v18 }
  0xda   :  { %v538_v28 = vmax.f32 %v521_v27, 1e-30  ;;  %v520_v40 = vld [vmem:[#allocation3 + $0x60] sm:$0xff] }
  0xdb   :  { %592 = vperm.xlu1 %1111, %v1119_v25   ;;  %v537_v43 = vmax.f32 %v520_v40, 1e-30 }
  0xdc   :  { %1130 = vrsqrt.f32 %v538_v28 }
  0xdd   :  { %v523_v32 = vld [vmem:[#allocation3 + $0x78] sm:$0xff]  ;;  %1132 = vrsqrt.f32 %v532_v29 }
  0xde   :  { %v1123_v33 = vpop.eup %1122  ;;  %v540_v34 = vmax.f32 %v523_v32, 1e-30  ;;  %v522_v44 = vld [vmem:[#allocation3 + $0x70] sm:$0xff] }
  0xdf   :  { %597 = vperm.xlu1 %1111, %v1121_v31   ;;  %622 = vperm.xlu0 %1110, %v1123_v33   ;;  %v1125_v37 = vpop.eup %1124  ;;  %v539_v47 = vmax.f32 %v522_v44, 1e-30 }
  0xe0   :  { %1134 = vrsqrt.f32 %v540_v34 }
  0xe1   :  { %1136 = vrsqrt.f32 %v533_v35 }
  0xe2   :  { %v1127_v38 = vpop.eup %1126  ;;  %1138 = vrsqrt.f32 %v535_v39 }
  0xe3   :  { %602 = vperm.xlu1 %1111, %v1125_v37   ;;  %632 = vperm.xlu0 %1110, %v1127_v38   ;;  %v1129_v41 = vpop.eup %1128  ;;  %1140 = vrsqrt.f32 %v537_v43 }
  0xe4   :  { %1142 = vrsqrt.f32 %v539_v47 }
  0xe6   :  { %v1131_v42 = vpop.eup %1130 }
  0xe7   :  { %607 = vperm.xlu1 %1111, %v1129_v41   ;;  %642 = vperm.xlu0 %1110, %v1131_v42   ;;  %v1133_v45 = vpop.eup %1132 }
  0xea   :  { %v1135_v46 = vpop.eup %1134 }
  0xeb   :  { %612 = vperm.xlu1 %1111, %v1133_v45   ;;  %652 = vperm.xlu0 %1110, %v1135_v46   ;;  %v1137_v48 = vpop.eup %1136 }
  0xec   :  { %v1139_v49 = vpop.eup %1138 }
  0xed   :  { %v1141_v50 = vpop.eup %1140 }
  0xee   :  { %v1143_v51 = vpop.eup %1142 }
  0xef   :  { %617 = vperm.xlu1 %1111, %v1137_v48  }
  0xf3   :  { %627 = vperm.xlu1 %1111, %v1139_v49  }
  0xf7   :  { %637 = vperm.xlu1 %1111, %v1141_v50  }
  0xfb   :  { %647 = vperm.xlu1 %1111, %v1143_v51  }
 0x13e   :  { %v985_v53 = vpop.f32.mrb[0].mxu0 }
 0x13f   :  { %v483_v54 = vpop.f32.mrb[0].mxu1  ;;  %v192_v55 = vpop.f32.mrb[1].mxu0  ;;  %v560_v13 = vmul.f32 2.0, %v985_v53 }
 0x140   :  { %v487_v56 = vadd.f32 %v483_v54, %v400_v52  ;;  %v1041_v57 = vpop.f32.mrb[1].mxu1  ;;  %v559_v14 = vmul.f32 2.0, %v192_v55 }
 0x142   :  { %488 = vst [vmem:[#allocation4] sm:$0x1] %v487_v56  ;;  %v988_v58 = vpop.f32.mrb[2].mxu0 }
 0x143   :  { %v202_v59 = vpop.f32.mrb[3].mxu0  ;;  %v562_v21 = vmul.f32 2.0, %v988_v58 }
 0x144   :  { %v561_v15 = vmul.f32 2.0, %v202_v59 }
 0x146   :  { %v991_v60 = vpop.f32.mrb[4].mxu0 }
 0x147   :  { %v212_v61 = vpop.f32.mrb[5].mxu0  ;;  %v564_v40 = vmul.f32 2.0, %v991_v60 }
 0x148   :  { %v563_v31 = vmul.f32 2.0, %v212_v61 }
 0x149   :  { %v524_v62 = vld [vmem:[#allocation4] sm:$0x1] }
 0x14a   :  { %v557_v63 = vmax.f32 %v524_v62, 1e-30  ;;  %v994_v1 = vpop.f32.mrb[6].mxu0 }
 0x14b   :  { %v222_v4 = vpop.f32.mrb[7].mxu0  ;;  %v566_v55 = vmul.f32 2.0, %v994_v1 }
 0x14c   :  { %1144 = vrsqrt.f32 %v557_v63  ;;  %v565_v48 = vmul.f32 2.0, %v222_v4 }
 0x14e   :  { %v997_v5 = vpop.f32.mrb[8].mxu0  ;;  %v578_v17 = vpop.permute.xlu0 %577 }
 0x14f   :  { %v232_v7 = vpop.f32.mrb[9].mxu0  ;;  %v655_v26 = vmul.f32 %v578_v17, %v559_v14  ;;  %v568_v50 = vmul.f32 2.0, %v997_v5 }
 0x150   :  { %v567_v4 = vmul.f32 2.0, %v232_v7 }
 0x152   :  { %v583_v8 = vpop.permute.xlu1 %582  ;;  %v1000_v11 = vpop.f32.mrb[10].mxu0 }
 0x153   :  { %v1384_v16 = vpop.f32.mrb[11].mxu0  ;;  %v656_v0 = vmul.f32 %v583_v8, %v560_v13  ;;  %v570_v59 = vmul.f32 2.0, %v1000_v11 }
 0x154   :  { %v569_v11 = vmul.f32 2.0, %v1384_v16 }
 0x156   :  { %v1145_v20 = vpop.eup %1144  ;;  %v588_v22 = vpop.permute.xlu1 %587 }
 0x157   :  { %v1003_v23 = vpop.f32.mrb[12].mxu0  ;;  %v1386_v24 = vrot.slane %v1145_v20, %v674_v12  ;;  %v657_v2 = vmul.f32 %v588_v22, %v561_v15 }
 0x158   :  { %v1388_v9 = vpop.f32.mrb[13].mxu0  ;;  %v572_v13 = vmul.f32 2.0, %v1003_v23 }
 0x159   :  { %v677_v10 = vmul.f32 %v1386_v24, %v655_v26  ;;  %v678_v18 = vmul.f32 %v1386_v24, %v656_v0  ;;  %v679_v19 = vmul.f32 %v1386_v24, %v657_v2  ;;  %v571_v23 = vmul.f32 2.0, %v1388_v9 }
 0x15a   :  { %v593_v25 = vpop.permute.xlu1 %592  ;;  %v1006_v27 = vpop.f32.mrb[14].mxu0 }
 0x15b   :  { %v693_v28 = vsub.f32 2.0, %v677_v10  ;;  %v694_v29 = vsub.f32 2.0, %v678_v18  ;;  %v658_v30 = vmul.f32 %v593_v25, %v562_v21  ;;  %v1393_v32 = vpop.f32.mrb[15].mxu0  ;;  %v695_v35 = vsub.f32 2.0, %v679_v19 }
 0x15c   :  { %v574_v26 = vmul.f32 2.0, %v1006_v27 }
 0x15d   :  { %v709_v33 = vmax.f32 %v693_v28, 0.0  ;;  %v710_v34 = vmax.f32 %v694_v29, 0.0  ;;  %v680_v36 = vmul.f32 %v1386_v24, %v658_v30  ;;  %v711_v43 = vmax.f32 %v695_v35, 0.0 }
 0x15e   :  { %v598_v37 = vpop.permute.xlu1 %597  ;;  %v623_v42 = vpop.permute.xlu0 %622 }
 0x15f   :  { %v858_v38 = vpack.c.bf16 %v710_v34, %v709_v33  ;;  %v696_v39 = vsub.f32 2.0, %v680_v36  ;;  %v659_v41 = vmul.f32 %v598_v37, %v563_v31  ;;  %v664_v58 = vmul.f32 %v623_v42, %v568_v50 }
 0x161   :  { %859 = vst [vmem:[#allocation10] sm:$0xff] %v858_v38   ;;  %v712_v44 = vmax.f32 %v696_v39, 0.0  ;;  %v681_v45 = vmul.f32 %v1386_v24, %v659_v41  ;;  %v686_v5 = vmul.f32 %v1386_v24, %v664_v58  ;;  %v573_v39 = vmul.f32 2.0, %v1393_v32 }
 0x162   :  { %v603_v46 = vpop.permute.xlu1 %602  ;;  %v633_v53 = vpop.permute.xlu0 %632 }
 0x163   :  { %v863_v47 = vpack.c.bf16 %v712_v44, %v711_v43  ;;  %v660_v49 = vmul.f32 %v603_v46, %v564_v40  ;;  %v697_v51 = vsub.f32 2.0, %v681_v45  ;;  %v666_v8 = vmul.f32 %v633_v53, %v570_v59 }
 0x164   :  { %v702_v21 = vsub.f32 2.0, %v686_v5 }
 0x165   :  { %895 = vst [vmem:[#allocation10 + $0x8] sm:$0xff] %v863_v47   ;;  %v682_v52 = vmul.f32 %v1386_v24, %v660_v49  ;;  %v713_v60 = vmax.f32 %v697_v51, 0.0  ;;  %v688_v22 = vmul.f32 %v1386_v24, %v666_v8 }
 0x166   :  { %v608_v54 = vpop.permute.xlu1 %607  ;;  %v643_v12 = vpop.permute.xlu0 %642  ;;  %v718_v30 = vmax.f32 %v702_v21, 0.0 }
 0x167   :  { %v698_v56 = vsub.f32 2.0, %v682_v52  ;;  %v661_v57 = vmul.f32 %v608_v54, %v565_v48  ;;  %v668_v0 = vmul.f32 %v643_v12, %v572_v13  ;;  %v704_v16 = vsub.f32 2.0, %v688_v22 }
 0x169   :  { %v714_v61 = vmax.f32 %v698_v56, 0.0  ;;  %v683_v62 = vmul.f32 %v1386_v24, %v661_v57  ;;  %v690_v31 = vmul.f32 %v1386_v24, %v668_v0  ;;  %v720_v40 = vmax.f32 %v704_v16, 0.0 }
 0x16a   :  { %v613_v63 = vpop.permute.xlu1 %612  ;;  %v653_v18 = vpop.permute.xlu0 %652 }
 0x16b   :  { %v868_v3 = vpack.c.bf16 %v714_v61, %v713_v60  ;;  %v662_v6 = vmul.f32 %v613_v63, %v566_v55  ;;  %v699_v14 = vsub.f32 2.0, %v683_v62  ;;  %v670_v33 = vmul.f32 %v653_v18, %v574_v26 }
 0x16c   :  { %v706_v9 = vsub.f32 2.0, %v690_v31 }
 0x16d   :  { %896 = vst [vmem:[#allocation10 + $0x10] sm:$0xff] %v868_v3   ;;  %v684_v1 = vmul.f32 %v1386_v24, %v662_v6  ;;  %v715_v7 = vmax.f32 %v699_v14, 0.0  ;;  %v692_v41 = vmul.f32 %v1386_v24, %v670_v33 }
 0x16e   :  { %v618_v15 = vpop.permute.xlu1 %617  ;;  %v722_v48 = vmax.f32 %v706_v9, 0.0 }
 0x16f   :  { %v700_v17 = vsub.f32 2.0, %v684_v1  ;;  %v663_v20 = vmul.f32 %v618_v15, %v567_v4  ;;  %v708_v49 = vsub.f32 2.0, %v692_v41 }
 0x171   :  { %v716_v2 = vmax.f32 %v700_v17, 0.0  ;;  %v685_v10 = vmul.f32 %v1386_v24, %v663_v20  ;;  %v724_v53 = vmax.f32 %v708_v49, 0.0 }
 0x172   :  { %v628_v19 = vpop.permute.xlu1 %627 }
 0x173   :  { %v873_v25 = vpack.c.bf16 %v716_v2, %v715_v7  ;;  %v701_v28 = vsub.f32 2.0, %v685_v10  ;;  %v665_v29 = vmul.f32 %v628_v19, %v569_v11 }
 0x175   :  { %897 = vst [vmem:[#allocation10 + $0x18] sm:$0xff] %v873_v25   ;;  %v717_v34 = vmax.f32 %v701_v28, 0.0  ;;  %v687_v27 = vmul.f32 %v1386_v24, %v665_v29 }
 0x176   :  { %v638_v35 = vpop.permute.xlu1 %637 }
 0x177   :  { %v878_v36 = vpack.c.bf16 %v718_v30, %v717_v34  ;;  %v703_v37 = vsub.f32 2.0, %v687_v27  ;;  %v667_v38 = vmul.f32 %v638_v35, %v571_v23 }
 0x179   :  { %898 = vst [vmem:[#allocation10 + $0x20] sm:$0xff] %v878_v36   ;;  %v719_v42 = vmax.f32 %v703_v37, 0.0  ;;  %v689_v43 = vmul.f32 %v1386_v24, %v667_v38 }
 0x17a   :  { %v648_v44 = vpop.permute.xlu1 %647 }
 0x17b   :  { %v883_v45 = vpack.c.bf16 %v720_v40, %v719_v42  ;;  %v705_v46 = vsub.f32 2.0, %v689_v43  ;;  %v669_v47 = vmul.f32 %v648_v44, %v573_v39 }
 0x17d   :  { %899 = vst [vmem:[#allocation10 + $0x28] sm:$0xff] %v883_v45   ;;  %v721_v50 = vmax.f32 %v705_v46, 0.0  ;;  %v691_v51 = vmul.f32 %v1386_v24, %v669_v47 }
 0x17f   :  { %v888_v52 = vpack.c.bf16 %v722_v48, %v721_v50  ;;  %v707_v32 = vsub.f32 2.0, %v691_v51 }
 0x181   :  { %900 = vst [vmem:[#allocation10 + $0x30] sm:$0xff] %v888_v52   ;;  %v723_v54 = vmax.f32 %v707_v32, 0.0 }
 0x183   :  { %v893_v55 = vpack.c.bf16 %v724_v53, %v723_v54 }
 0x185   :  { %901 = vst [vmem:[#allocation10 + $0x38] sm:$0xff] %v893_v55  }
 0x186   :  { %1201 = shalt.err (!%p1198_p6)
}
 0x187   :  { %s1202_s10 = scalar_lea.hbm %s1425_s2, 1024 }
 0x188   :  { %p1203_p7 = scmp.ne.s32.totalorder %s1425_s2, %s1202_s10  ;;  %p1206_p8 = scmp.lt.u32.totalorder %s1202_s10, %s1425_s2 }
 0x18a   :  { %p1208_p9 = pnand %p1206_p8, %p1203_p7 }
 0x18c   :  { %1211 = shalt.err (!%p1208_p9)
}
 0x18d   :  { %s1228_s15 = smov 64   ;;  %s1229_s16 = smov 4  }
 0x18e   :  { %816 = dma.vmem_to_hbm [thread:$0]  %s811_s6, 1024, %s1425_s2, [#allocation7], %s1228_s15, %s1228_s15, %s1229_s16  }
 0x18f   :  { %1216 = dma.done.wait [#allocation7], 1024  }
 0x190   :  { %1217 = vsyncadd [#allocation7], 4294966272 }
 0x191   :  { %820 = vsyncpa [#allocation6], 1 }
 0x192   :  { %821 = vsyncpa [#allocation9], 1 }
 0x193   :  { %822 = vsyncpa [#allocation7], 1 }

</bundles_post_ra>
